<compile_context>
chip_gen: v6e
topology: v6e:2x2x1
jax: 0.10.0
libtpu: 0.0.40
codegen_flags: <defaults>
</compile_context>

<pallas_src>
import functools

import jax
import jax.numpy as jnp
from jax import lax
from jax.experimental import pallas as pl
from jax.experimental.pallas import tpu as pltpu


def _sliding_max_2d(m, patch_size):
    """(R, W) -> (R, W). Entry [i, j] = max of m[i:i+P, j:j+P] (cyclic wrap);
    only entries whose full window stays inside a valid region are used by the
    caller.  Log-doubling running max; shifts go to the XLU via pltpu.roll."""
    P = patch_size

    def one_axis(r, axis):
        n = r.shape[axis]
        w = 1
        while 2 * w <= P:
            # r[i] <- max(r[i], r[i+w])  (left shift by w == roll by n-w)
            r = jnp.maximum(r, pltpu.roll(r, shift=(n - w) % n, axis=axis))
            w *= 2
        if w < P:
            r = jnp.maximum(r, pltpu.roll(r, shift=(n - (P - w)) % n, axis=axis))
        return r

    r = one_axis(m, axis=1)   # along W (lanes)
    r = one_axis(r, axis=0)   # along stacked H (sublanes)
    return r


def _cc_loss_kernel(x_ref, y_ref, out_ref, *, patch_size, h_valid, w_valid):
    """One batch element per grid step.  Builds the stacked channel-min slab
    for X and Y, runs one sliding P x P max on it, masks and folds the abs
    diff to a single lane-dense (8, 128) partial block."""
    P = patch_size
    _, C, Hp, Wp = x_ref.shape      # padded spatial dims
    D = C - 2
    Ho, Wo = h_valid - P + 1, w_valid - P + 1

    def chan_mins(ref):
        # Load each channel plane once; share pairwise mins between windows.
        planes = [ref[0, c, :, :] for c in range(C)]
        pairs = [jnp.minimum(planes[c], planes[c + 1]) for c in range(C - 1)]
        return [jnp.minimum(pairs[d], planes[d + 2]) for d in range(D)]

    # Stack [X cmin_0..D-1 ; Y cmin_0..D-1] along sublanes: (2*D*Hp, Wp),
    # native dtype (min/max are exact in any dtype).
    slab = jnp.concatenate(chan_mins(x_ref) + chan_mins(y_ref), axis=0)
    r = _sliding_max_2d(slab, P)

    # Static per-plane validity mask (shared by every plane).
    row = lax.broadcasted_iota(jnp.int32, (Hp, Wp), 0)
    col = lax.broadcasted_iota(jnp.int32, (Hp, Wp), 1)
    valid = jnp.logical_and(row < Ho, col < Wo)

    # |CC(X) - CC(Y)| per plane (f32), masked, folded onto one (8, Wp) strip
    # with aligned whole-vreg adds.  d*Hp is a multiple of 8 -> cheap slices.
    acc = jnp.zeros((8, Wp), jnp.float32)
    for d in range(D):                      # D = C-2: small & static
        cx = r[d * Hp:(d + 1) * Hp, :]
        cy = r[(D + d) * Hp:(D + d + 1) * Hp, :]
        diff = jnp.where(
            valid,
            jnp.abs(cx.astype(jnp.float32) - cy.astype(jnp.float32)),
            0.0)
        for r0 in range(0, Hp, 8):          # sublane fold
            acc = acc + diff[r0:r0 + 8, :]

    # Lane fold to a single (8, 128) block; store is unmasked / lane-dense.
    out = acc[:, 0:128]
    for c0 in range(128, Wp, 128):
        out = out + acc[:, c0:c0 + 128]
    out_ref[...] = out[None, :, :]


def cc_loss(X, Y, patch_size=35):
    assert X.shape == Y.shape
    N, C, H, W = X.shape
    P = patch_size
    D = C - 2                               # channel windows of size 3, stride 1
    Ho, Wo = H - P + 1, W - P + 1
    assert D >= 1 and Ho >= 1 and Wo >= 1

    # Pad to (8, 128)-friendly spatial dims.  Pad value is irrelevant: a valid
    # window starting at i < Ho / j < Wo ends at i+P-1 <= H-1 / j+P-1 <= W-1,
    # so padded rows/cols never enter any valid window.
    Hp = ((H + 7) // 8) * 8
    Wp = ((W + 127) // 128) * 128
    if (Hp, Wp) != (H, W):
        pad = ((0, 0), (0, 0), (0, Hp - H), (0, Wp - W))
        X = jnp.pad(X, pad)
        Y = jnp.pad(Y, pad)

    kernel = functools.partial(_cc_loss_kernel, patch_size=P,
                               h_valid=H, w_valid=W)

    partials = pl.pallas_call(
        kernel,
        out_shape=jax.ShapeDtypeStruct((N, 8, 128), jnp.float32),
        grid_spec=pltpu.PrefetchScalarGridSpec(
            num_scalar_prefetch=0,
            grid=(N,),
            in_specs=[
                pl.BlockSpec((1, C, Hp, Wp), lambda b: (b, 0, 0, 0)),
                pl.BlockSpec((1, C, Hp, Wp), lambda b: (b, 0, 0, 0)),
            ],
            out_specs=pl.BlockSpec((1, 8, 128), lambda b: (b, 0, 0)),
        ),
        compiler_params=pltpu.CompilerParams(
            dimension_semantics=("parallel",)),
    )(X, Y)

    # L1Loss default reduction = 'mean' over the (N, 1, D, Ho, Wo) CC arrays.
    return jnp.sum(partials) / jnp.float32(N * D * Ho * Wo)


def cc_loss_ref(X, Y, patch_size=35):
    """Pure-JAX reference for validation."""
    def cc(x):
        m = jnp.minimum(jnp.minimum(x[:, :-2], x[:, 1:-1]), x[:, 2:])
        return lax.reduce_window(
            m, -jnp.inf, lax.max,
            window_dimensions=(1, 1, patch_size, patch_size),
            window_strides=(1, 1, 1, 1),
            padding="VALID")
    return jnp.mean(jnp.abs(cc(X) - cc(Y)))


if __name__ == "__main__":
    key = jax.random.PRNGKey(0)
    kx, ky = jax.random.split(key)

    # Aligned case: W=128 (lane-dense), H=40 (multiple of 8), P=35.
    N, C, H, W = 2, 4, 40, 128
    X = jax.random.normal(kx, (N, C, H, W), dtype=jnp.float32)
    Y = jax.random.normal(ky, (N, C, H, W), dtype=jnp.float32)
    out = jax.block_until_ready(cc_loss(X, Y, patch_size=35))
    ref = cc_loss_ref(X, Y, patch_size=35)
    assert jnp.allclose(out, ref, atol=1e-5, rtol=1e-5), (out, ref)

    # Unaligned case: exercises the wrapper H/W padding path.
    N2, C2, H2, W2 = 2, 3, 37, 100
    X2 = jax.random.normal(kx, (N2, C2, H2, W2), dtype=jnp.float32)
    Y2 = jax.random.normal(ky, (N2, C2, H2, W2), dtype=jnp.float32)
    out2 = jax.block_until_ready(cc_loss(X2, Y2, patch_size=35))
    ref2 = cc_loss_ref(X2, Y2, patch_size=35)
    assert jnp.allclose(out2, ref2, atol=1e-5, rtol=1e-5), (out2, ref2)

    print("KERNEL_OK")
</pallas_src>

<mosaic_0001>
module attributes {stable_mosaic.version = 11 : i64} {
  func.func @_cc_loss_kernel(%arg0: i32, %arg1: memref<1x4x40x128xf32, #tpu.memory_space<vmem>>, %arg2: memref<1x4x40x128xf32, #tpu.memory_space<vmem>>, %arg3: memref<1x8x128xf32, #tpu.memory_space<vmem>>) attributes {dimension_semantics = [#tpu.dimension_semantics<parallel>], iteration_bounds = array<i64: 2>, scalar_prefetch = 0 : i64, scratch_operands = 0 : i64, tpu.core_type = #tpu.core_type<tc>, window_params = [{transform_indices = @transform_0, window_bounds = array<i64: 1, 4, 40, 128>}, {transform_indices = @transform_1, window_bounds = array<i64: 1, 4, 40, 128>}, {transform_indices = @transform_2, window_bounds = array<i64: 1, 8, 128>}]} {
    %c0 = arith.constant 0 : index
    %c0_0 = arith.constant 0 : index
    %c0_1 = arith.constant 0 : index
    %c0_2 = arith.constant 0 : index
    %0 = vector.load %arg1[%c0, %c0_0, %c0_1, %c0_2] : memref<1x4x40x128xf32, #tpu.memory_space<vmem>>, vector<1x1x40x128xf32>
    %1 = vector.shape_cast %0 : vector<1x1x40x128xf32> to vector<40x128xf32>
    %c0_3 = arith.constant 0 : index
    %c1 = arith.constant 1 : index
    %c0_4 = arith.constant 0 : index
    %c0_5 = arith.constant 0 : index
    %2 = vector.load %arg1[%c0_3, %c1, %c0_4, %c0_5] : memref<1x4x40x128xf32, #tpu.memory_space<vmem>>, vector<1x1x40x128xf32>
    %3 = vector.shape_cast %2 : vector<1x1x40x128xf32> to vector<40x128xf32>
    %c0_6 = arith.constant 0 : index
    %c2 = arith.constant 2 : index
    %c0_7 = arith.constant 0 : index
    %c0_8 = arith.constant 0 : index
    %4 = vector.load %arg1[%c0_6, %c2, %c0_7, %c0_8] : memref<1x4x40x128xf32, #tpu.memory_space<vmem>>, vector<1x1x40x128xf32>
    %5 = vector.shape_cast %4 : vector<1x1x40x128xf32> to vector<40x128xf32>
    %c0_9 = arith.constant 0 : index
    %c3 = arith.constant 3 : index
    %c0_10 = arith.constant 0 : index
    %c0_11 = arith.constant 0 : index
    %6 = vector.load %arg1[%c0_9, %c3, %c0_10, %c0_11] : memref<1x4x40x128xf32, #tpu.memory_space<vmem>>, vector<1x1x40x128xf32>
    %7 = vector.shape_cast %6 : vector<1x1x40x128xf32> to vector<40x128xf32>
    %8 = arith.minimumf %1, %3 : vector<40x128xf32>
    %9 = arith.minimumf %3, %5 : vector<40x128xf32>
    %10 = arith.minimumf %8, %5 : vector<40x128xf32>
    %11 = arith.minimumf %9, %7 : vector<40x128xf32>
    %c0_12 = arith.constant 0 : index
    %c0_13 = arith.constant 0 : index
    %c0_14 = arith.constant 0 : index
    %c0_15 = arith.constant 0 : index
    %12 = vector.load %arg2[%c0_12, %c0_13, %c0_14, %c0_15] : memref<1x4x40x128xf32, #tpu.memory_space<vmem>>, vector<1x1x40x128xf32>
    %13 = vector.shape_cast %12 : vector<1x1x40x128xf32> to vector<40x128xf32>
    %c0_16 = arith.constant 0 : index
    %c1_17 = arith.constant 1 : index
    %c0_18 = arith.constant 0 : index
    %c0_19 = arith.constant 0 : index
    %14 = vector.load %arg2[%c0_16, %c1_17, %c0_18, %c0_19] : memref<1x4x40x128xf32, #tpu.memory_space<vmem>>, vector<1x1x40x128xf32>
    %15 = vector.shape_cast %14 : vector<1x1x40x128xf32> to vector<40x128xf32>
    %c0_20 = arith.constant 0 : index
    %c2_21 = arith.constant 2 : index
    %c0_22 = arith.constant 0 : index
    %c0_23 = arith.constant 0 : index
    %16 = vector.load %arg2[%c0_20, %c2_21, %c0_22, %c0_23] : memref<1x4x40x128xf32, #tpu.memory_space<vmem>>, vector<1x1x40x128xf32>
    %17 = vector.shape_cast %16 : vector<1x1x40x128xf32> to vector<40x128xf32>
    %c0_24 = arith.constant 0 : index
    %c3_25 = arith.constant 3 : index
    %c0_26 = arith.constant 0 : index
    %c0_27 = arith.constant 0 : index
    %18 = vector.load %arg2[%c0_24, %c3_25, %c0_26, %c0_27] : memref<1x4x40x128xf32, #tpu.memory_space<vmem>>, vector<1x1x40x128xf32>
    %19 = vector.shape_cast %18 : vector<1x1x40x128xf32> to vector<40x128xf32>
    %20 = arith.minimumf %13, %15 : vector<40x128xf32>
    %21 = arith.minimumf %15, %17 : vector<40x128xf32>
    %22 = arith.minimumf %20, %17 : vector<40x128xf32>
    %23 = arith.minimumf %21, %19 : vector<40x128xf32>
    %24 = tpu.concatenate %10, %11, %22, %23 in 0 : vector<40x128xf32>, vector<40x128xf32>, vector<40x128xf32>, vector<40x128xf32> -> vector<160x128xf32>
    %c127_i32 = arith.constant 127 : i32
    %25 = tpu.dynamic_rotate %24 by %c127_i32 dim 1 : vector<160x128xf32>, i32 -> vector<160x128xf32>
    %26 = arith.maximumf %24, %25 : vector<160x128xf32>
    %c126_i32 = arith.constant 126 : i32
    %27 = tpu.dynamic_rotate %26 by %c126_i32 dim 1 : vector<160x128xf32>, i32 -> vector<160x128xf32>
    %28 = arith.maximumf %26, %27 : vector<160x128xf32>
    %c124_i32 = arith.constant 124 : i32
    %29 = tpu.dynamic_rotate %28 by %c124_i32 dim 1 : vector<160x128xf32>, i32 -> vector<160x128xf32>
    %30 = arith.maximumf %28, %29 : vector<160x128xf32>
    %c120_i32 = arith.constant 120 : i32
    %31 = tpu.dynamic_rotate %30 by %c120_i32 dim 1 : vector<160x128xf32>, i32 -> vector<160x128xf32>
    %32 = arith.maximumf %30, %31 : vector<160x128xf32>
    %c112_i32 = arith.constant 112 : i32
    %33 = tpu.dynamic_rotate %32 by %c112_i32 dim 1 : vector<160x128xf32>, i32 -> vector<160x128xf32>
    %34 = arith.maximumf %32, %33 : vector<160x128xf32>
    %c125_i32 = arith.constant 125 : i32
    %35 = tpu.dynamic_rotate %34 by %c125_i32 dim 1 : vector<160x128xf32>, i32 -> vector<160x128xf32>
    %36 = arith.maximumf %34, %35 : vector<160x128xf32>
    %c159_i32 = arith.constant 159 : i32
    %37 = tpu.dynamic_rotate %36 by %c159_i32 dim 0 : vector<160x128xf32>, i32 -> vector<160x128xf32>
    %38 = arith.maximumf %36, %37 : vector<160x128xf32>
    %c158_i32 = arith.constant 158 : i32
    %39 = tpu.dynamic_rotate %38 by %c158_i32 dim 0 : vector<160x128xf32>, i32 -> vector<160x128xf32>
    %40 = arith.maximumf %38, %39 : vector<160x128xf32>
    %c156_i32 = arith.constant 156 : i32
    %41 = tpu.dynamic_rotate %40 by %c156_i32 dim 0 : vector<160x128xf32>, i32 -> vector<160x128xf32>
    %42 = arith.maximumf %40, %41 : vector<160x128xf32>
    %c152_i32 = arith.constant 152 : i32
    %43 = tpu.dynamic_rotate %42 by %c152_i32 dim 0 : vector<160x128xf32>, i32 -> vector<160x128xf32>
    %44 = arith.maximumf %42, %43 : vector<160x128xf32>
    %c144_i32 = arith.constant 144 : i32
    %45 = tpu.dynamic_rotate %44 by %c144_i32 dim 0 : vector<160x128xf32>, i32 -> vector<160x128xf32>
    %46 = arith.maximumf %44, %45 : vector<160x128xf32>
    %c157_i32 = arith.constant 157 : i32
    %47 = tpu.dynamic_rotate %46 by %c157_i32 dim 0 : vector<160x128xf32>, i32 -> vector<160x128xf32>
    %48 = arith.maximumf %46, %47 : vector<160x128xf32>
    %49 = tpu.iota {dimensions = array<i32: 0>} : vector<40x128xi32>
    %50 = tpu.iota {dimensions = array<i32: 1>} : vector<40x128xi32>
    %c6_i32 = arith.constant 6 : i32
    %51 = vector.broadcast %c6_i32 : i32 to vector<40x128xi32>
    %52 = arith.cmpi slt, %49, %51 : vector<40x128xi32>
    %c94_i32 = arith.constant 94 : i32
    %53 = vector.broadcast %c94_i32 : i32 to vector<40x128xi32>
    %54 = arith.cmpi slt, %50, %53 : vector<40x128xi32>
    %55 = arith.andi %52, %54 : vector<40x128xi1>
    %cst = arith.constant 0.000000e+00 : f32
    %56 = vector.broadcast %cst : f32 to vector<8x128xf32>
    %57 = vector.extract_strided_slice %48 {offsets = [0, 0], sizes = [40, 128], strides = [1, 1]} : vector<160x128xf32> to vector<40x128xf32>
    %58 = vector.extract_strided_slice %48 {offsets = [80, 0], sizes = [40, 128], strides = [1, 1]} : vector<160x128xf32> to vector<40x128xf32>
    %59 = arith.subf %57, %58 : vector<40x128xf32>
    %60 = math.absf %59 : vector<40x128xf32>
    %cst_28 = arith.constant 0.000000e+00 : f32
    %61 = vector.broadcast %cst_28 : f32 to vector<40x128xf32>
    %62 = arith.select %55, %60, %61 : vector<40x128xi1>, vector<40x128xf32>
    %63 = vector.extract_strided_slice %62 {offsets = [0, 0], sizes = [8, 128], strides = [1, 1]} : vector<40x128xf32> to vector<8x128xf32>
    %64 = arith.addf %56, %63 : vector<8x128xf32>
    %65 = vector.extract_strided_slice %62 {offsets = [8, 0], sizes = [8, 128], strides = [1, 1]} : vector<40x128xf32> to vector<8x128xf32>
    %66 = arith.addf %64, %65 : vector<8x128xf32>
    %67 = vector.extract_strided_slice %62 {offsets = [16, 0], sizes = [8, 128], strides = [1, 1]} : vector<40x128xf32> to vector<8x128xf32>
    %68 = arith.addf %66, %67 : vector<8x128xf32>
    %69 = vector.extract_strided_slice %62 {offsets = [24, 0], sizes = [8, 128], strides = [1, 1]} : vector<40x128xf32> to vector<8x128xf32>
    %70 = arith.addf %68, %69 : vector<8x128xf32>
    %71 = vector.extract_strided_slice %62 {offsets = [32, 0], sizes = [8, 128], strides = [1, 1]} : vector<40x128xf32> to vector<8x128xf32>
    %72 = arith.addf %70, %71 : vector<8x128xf32>
    %73 = vector.extract_strided_slice %48 {offsets = [40, 0], sizes = [40, 128], strides = [1, 1]} : vector<160x128xf32> to vector<40x128xf32>
    %74 = vector.extract_strided_slice %48 {offsets = [120, 0], sizes = [40, 128], strides = [1, 1]} : vector<160x128xf32> to vector<40x128xf32>
    %75 = arith.subf %73, %74 : vector<40x128xf32>
    %76 = math.absf %75 : vector<40x128xf32>
    %cst_29 = arith.constant 0.000000e+00 : f32
    %77 = vector.broadcast %cst_29 : f32 to vector<40x128xf32>
    %78 = arith.select %55, %76, %77 : vector<40x128xi1>, vector<40x128xf32>
    %79 = vector.extract_strided_slice %78 {offsets = [0, 0], sizes = [8, 128], strides = [1, 1]} : vector<40x128xf32> to vector<8x128xf32>
    %80 = arith.addf %72, %79 : vector<8x128xf32>
    %81 = vector.extract_strided_slice %78 {offsets = [8, 0], sizes = [8, 128], strides = [1, 1]} : vector<40x128xf32> to vector<8x128xf32>
    %82 = arith.addf %80, %81 : vector<8x128xf32>
    %83 = vector.extract_strided_slice %78 {offsets = [16, 0], sizes = [8, 128], strides = [1, 1]} : vector<40x128xf32> to vector<8x128xf32>
    %84 = arith.addf %82, %83 : vector<8x128xf32>
    %85 = vector.extract_strided_slice %78 {offsets = [24, 0], sizes = [8, 128], strides = [1, 1]} : vector<40x128xf32> to vector<8x128xf32>
    %86 = arith.addf %84, %85 : vector<8x128xf32>
    %87 = vector.extract_strided_slice %78 {offsets = [32, 0], sizes = [8, 128], strides = [1, 1]} : vector<40x128xf32> to vector<8x128xf32>
    %88 = arith.addf %86, %87 : vector<8x128xf32>
    %89 = vector.shape_cast %88 : vector<8x128xf32> to vector<1x8x128xf32>
    %c0_30 = arith.constant 0 : index
    %c0_31 = arith.constant 0 : index
    %c0_32 = arith.constant 0 : index
    %90 = vector.load %arg3[%c0_30, %c0_31, %c0_32] : memref<1x8x128xf32, #tpu.memory_space<vmem>>, vector<1x8x128xf32>
    tpu.vector_store %arg3[%c0_30, %c0_31, %c0_32], %89 {strides = array<i32>} : memref<1x8x128xf32, #tpu.memory_space<vmem>>, vector<1x8x128xf32>,
    return
  }
  func.func @transform_0(%arg0: i32) -> (i32, i32, i32, i32) {
    %c0_i32 = arith.constant 0 : i32
    %c0_i32_0 = arith.constant 0 : i32
    %c0_i32_1 = arith.constant 0 : i32
    %c0_i32_2 = arith.constant 0 : i32
    return %arg0, %c0_i32, %c0_i32_0, %c0_i32_1 : i32, i32, i32, i32
  }
  func.func @transform_1(%arg0: i32) -> (i32, i32, i32, i32) {
    %c0_i32 = arith.constant 0 : i32
    %c0_i32_0 = arith.constant 0 : i32
    %c0_i32_1 = arith.constant 0 : i32
    %c0_i32_2 = arith.constant 0 : i32
    return %arg0, %c0_i32, %c0_i32_0, %c0_i32_1 : i32, i32, i32, i32
  }
  func.func @transform_2(%arg0: i32) -> (i32, i32, i32) {
    %c0_i32 = arith.constant 0 : i32
    %c0_i32_0 = arith.constant 0 : i32
    %c0_i32_1 = arith.constant 0 : i32
    return %arg0, %c0_i32, %c0_i32_0 : i32, i32, i32
  }
}

</mosaic_0001>

<bundles_post_ra>
// kernel: tpu_custom_call.1
= control target key start
LH: loop header
LB: loop body
LE: loop exit
PB: predicated region body
PF: predicated region fallthrough
CT: control target
= control target key end

     0   :  { %7 = vsyncpa [#allocation3], 0  ;;  %s2109_s0 = inlined_call_operand.hbm [shape: f32[2,4,40,128], index: 0, kind: input, shape index: {}]   ;;  %s2110_s1 = inlined_call_operand.hbm [shape: f32[2,4,40,128], index: 1, kind: input, shape index: {}]   ;;  %s2111_s2 = inlined_call_operand.hbm [shape: f32[2,8,128], index: 2, kind: output, shape index: {}]  }
   0x1   :  { %9 = vsyncpa [#allocation3 + $0x1], 0 }
   0x2   :  { %10 = vsyncpa [#allocation6], 0 }
   0x3   :  { %12 = vsyncpa [#allocation6 + $0x1], 0 }
   0x4   :  { %13 = vsyncpa [#allocation4], 0 }
   0x5   :  { %15 = vsyncpa [#allocation4 + $0x1], 0  ;;  %s1355_s9 = smov 0   ;;  %s1357_s10 = smov 0  }
   0x6   :  { %s1359_s11 = smov 0   ;;  %s1361_s12 = smov 0  }
   0x7 LB: > { %s1376_s13 = sadd.s32 4294967295, %s1327_s12   ;;  %s1098_s14 = sadd.s32 4294967294, %s1327_s12   ;;  %s1327_s12 = sphi %s1361_s12, %s2126_s12   ;;  %s1323_s11 = sphi %s1359_s11, %s2125_s11   ;;  %s1319_s10 = sphi %s1357_s10, %s2124_s10   ;;  %s1315_s9 = sphi %s1355_s9, %s2123_s9  }
   0x8   : > { %s1380_s15 = sadd.s32 1, %s1327_s12   ;;  %s28_s16 = sadd.s32 1, %s1323_s11 }
   0x9   : > { %s25_s17 = ssub.s32 %s1327_s12, %s1380_s15  ;;  %p35_p0 = scmp.ne.s32.totalorder %s1323_s11, %s1319_s10 }
   0xa   : > { %p26_p1 = scmp.eq.s32.totalorder %s25_s17, 0  ;;  %p36_p2 = scmp.eq.s32.totalorder %s1327_s12, 0 }
   0xb   : > { %p41_p3 = scmp.ne.s32.totalorder %s1319_s10, %s1315_s9  ;;  %p42_p4 = scmp.eq.s32.totalorder %s1376_s13, 0 }
   0xc   : > { %s1392_s18 = scalar_select %p26_p1, %s1323_s11, %s28_s16  }
   0xd   : > { %p37_p5 = por %p36_p2, %p35_p0  ;;  %p1394_p6 = por %p42_p4, %p41_p3 }
   0xe   : > { %p91_p7 = scmp.eq.s32.totalorder %s1376_s13, 1  ;;  %p97_p8 = scmp.eq.s32.totalorder %s1098_s14, 1 }
   0xf   : > { %s2114_s19 = scalar_select %p1394_p6, 1, 0 }
  0x10   : > { %p1161_p10 = scmp.lt.s32.totalorder %s1327_s12, 2  ;;  %p1401_p11 = por %p91_p7, %p35_p0 }
  0x11   : > { %p1405_p12 = por %p97_p8, %p41_p3  ;;  %s1410_s22 = sand.u32 1, %s1323_s11  }
  0x12   : > { %s2115_s20 = scalar_select %p1401_p11, 1, 0 }
  0x13   : > { %s2116_s21 = scalar_select %p1405_p12, 1, 0 }
  0x14   : > { %s1140_s23 = smul.u32 2560, %s1327_s12  ;;  %p1421_p13 = pnand %p1161_p10, %p37_p5 }
  0x15   : > { %s1139_s24 = smul.u32 160, %s1410_s22  ;;  %s118_s3 = scalar_lea.sflag [#allocation3], %s1410_s22 }
  0x16   : > { %s1419_s27 = scalar_lea.hbm %s2109_s0, %s1140_s23  ;;  %p1205_p1 = pneg %p1421_p13 }
  0x17   : > { %s121_s29 = scalar_lea.vmem [#allocation2], %s1139_s24  ;;  %s1203_s4 = scalar_lea.hbm %s1419_s27, 2560 }
  0x18   : > { %s128_s30 = sshll.u32 %s121_s29, 4  ;;  %p1204_p0 = scmp.ne.s32.totalorder %s1419_s27, %s1203_s4  ;;  %s1427_s30 = int_to_ptr.vmem [resolvable:$true] %s128_s30 }
  0x19   : > { %s1208_s7 = scalar_lea.hbm %s2109_s0, 5120  ;;  %p1209_p4 = scmp.lt.s32.totalorder %s1419_s27, %s2109_s0 }
  0x1a   : > { %p1206_p2 = pnand %p1205_p1, %p1204_p0  ;;  %p1210_p5 = scmp.lt.s32.totalorder %s1208_s7, %s1203_s4 }
  0x1c   : > { %p1207_p3 = pneg %p1206_p2  ;;  %p1211_p7 = por %p1210_p5, %p1209_p4 }
  0x1e   : > { %p1212_p8 = pnand %p1211_p7, %p1207_p3 }
  0x20   : > { %1215 = shalt.err (!%p1212_p8)
}
  0x21   : > { %s1216_s16 = scalar_lea.vmem %s1427_s30, 2560  ;;  %s1329_s17 = smov [#allocation2]  }
  0x22   : > { %p1217_p10 = scmp.ne.s32.totalorder %s1427_s30, %s1216_s16  ;;  %s1221_s25 = sshll.u32 %s1329_s17, 4  ;;  %s1222_s25 = int_to_ptr.vmem [resolvable:$false] %s1221_s25 }
  0x23   : > { %s1223_s26 = scalar_lea.vmem %s1222_s25, 5120  ;;  %p1224_p9 = scmp.lt.s32.totalorder %s1427_s30, %s1222_s25 }
  0x24   : > { %p1219_p0 = pnand %p1217_p10, %p1205_p1  ;;  %p1225_p12 = scmp.lt.s32.totalorder %s1223_s26, %s1216_s16 }
  0x26   : > { %p1220_p2 = pneg %p1219_p0  ;;  %p1226_p11 = por %p1225_p12, %p1224_p9 }
  0x28   : > { %p1227_p4 = pnand %p1226_p11, %p1220_p2 }
  0x2a   : > { %1230 = shalt.err (!%p1227_p4)
}
  0x2b   : > { %s1330_s29 = smov 128   ;;  %s1331_s4 = smov 8  }
  0x2c   : > { %1153 = dma.hbm_to_vmem [thread:$0]  (!%p1421_p13), %s1419_s27, 2560, %s1427_s30, %s118_s3, %s1330_s29, %s1330_s29, %s1331_s4  }
  0x2d   : > { %p1103_p9 = scmp.ge.s32.totalorder %s1327_s12, 1  ;;  %p157_p11 = scmp.lt.s32.totalorder %s1327_s12, 3 }
  0x2e   : > { %s1470_s8 = scalar_lea.hbm %s2110_s1, %s1140_s23  ;;  %s142_s14 = scalar_lea.vmem [#allocation5], %s1139_s24 }
  0x2f   : > { %p1461_p12 = pnand %p1103_p9, %p157_p11  ;;  %s149_s16 = sshll.u32 %s142_s14, 4  ;;  %s1474_s16 = int_to_ptr.vmem [resolvable:$true] %s149_s16 }
  0x30   : > { %s139_s27 = scalar_lea.sflag [#allocation6], %s1410_s22  ;;  %s1231_s30 = scalar_lea.hbm %s1470_s8, 2560 }
  0x31   : > { %p1232_p3 = scmp.ne.s32.totalorder %s1470_s8, %s1231_s30  ;;  %s1236_s23 = scalar_lea.hbm %s2110_s1, 5120 }
  0x32   : > { %p1237_p8 = scmp.lt.s32.totalorder %s1470_s8, %s2110_s1  ;;  %p1238_p10 = scmp.lt.s32.totalorder %s1236_s23, %s1231_s30 }
  0x33   : > { %p1234_p5 = pnand %p1232_p3, %p1205_p1 }
  0x34   : > { %p1239_p0 = por %p1238_p10, %p1237_p8 }
  0x35   : > { %p1235_p7 = pneg %p1234_p5 }
  0x37   : > { %p1240_p2 = pnand %p1239_p0, %p1235_p7 }
  0x39   : > { %1243 = shalt.err (!%p1240_p2)
}
  0x3a   : > { %s1244_s22 = scalar_lea.vmem %s1474_s16, 2560  ;;  %s1332_s24 = smov [#allocation5]  }
  0x3b   : > { %p1245_p4 = scmp.ne.s32.totalorder %s1474_s16, %s1244_s22  ;;  %s1249_s6 = sshll.u32 %s1332_s24, 4  ;;  %s1250_s6 = int_to_ptr.vmem [resolvable:$false] %s1249_s6 }
  0x3c   : > { %s1251_s7 = scalar_lea.vmem %s1250_s6, 5120  ;;  %p1252_p3 = scmp.lt.s32.totalorder %s1474_s16, %s1250_s6 }
  0x3d   : > { %p1247_p9 = pnand %p1245_p4, %p1205_p1  ;;  %p1253_p5 = scmp.lt.s32.totalorder %s1251_s7, %s1244_s22 }
  0x3f   : > { %p1248_p11 = pneg %p1247_p9  ;;  %p1254_p6 = por %p1253_p5, %p1252_p3 }
  0x41   : > { %p1255_p8 = pnand %p1254_p6, %p1248_p11 }
  0x43   : > { %1258 = shalt.err (!%p1255_p8)
}
  0x44   : > { %1156 = dma.hbm_to_vmem [thread:$0]  (!%p1421_p13), %s1470_s8, 2560, %s1474_s16, %s139_s27, %s1330_s29, %s1330_s29, %s1331_s4  }
  0x45   : > { %161 = sbr.rel (%p1461_p12) target bundleno = 874 (0x36a), region = 28  ;;  %s1505_s14 = sand.u32 (!%p1461_p12), 1, %s1319_s10  }
  0x46   : > { %s1143_s30 = smul.u32 (!%p1461_p12), 160, %s1505_s14  ;;  %s164_s3 = scalar_lea.sflag (!%p1461_p12), [#allocation3], %s1505_s14 }
  0x47   : > { %p2119_p6 = scmp.ne.s32.totalorder (!%p1461_p12), %s2114_s19, 0 }
  0x48   : > { %s1509_s17 = scalar_lea.vmem (!%p1461_p12), [#allocation2], %s1143_s30 }
  0x4a   : > { %1302 = dma.done.wait (%p2119_p6), %s164_s3, 2560  }
  0x4b   : > { %1304 = vsyncadd (%p2119_p6), %s164_s3, 4294964736  ;;  %s173_s28 = scalar_lea.sflag [#allocation6], %s1505_s14  ;;  %s1516_s29 = scalar_lea.vmem [#allocation5], %s1143_s30 }
  0x4c   : > { %1306 = dma.done.wait (%p2119_p6), %s173_s28, 2560  }
  0x4d   : > { %1308 = vsyncadd (%p2119_p6), %s173_s28, 4294964736  ;;  %v202_v0 = vld [vmem:[%s1509_s17] sm:$0xff]  ;;  %v1105_v1 = vld [vmem:[%s1509_s17 + $0x28] sm:$0xff]  ;;  %s1333_s19 = smov 127   ;;  %s1334_s4 = smov 126  }
  0x4e   : > { %v1110_v2 = vld [vmem:[%s1509_s17 + $0x50] sm:$0xff]  ;;  %v225_v3 = vmin.f32 %v202_v0, %v1105_v1  ;;  %v1107_v5 = vld [vmem:[%s1509_s17 + $0x38] sm:$0xff]  ;;  %v1112_v6 = vld [vmem:[%s1509_s17 + $0x60] sm:$0xff]  ;;  %s1335_s5 = smov 124   ;;  %s1336_s8 = smov 120  }
  0x4f   : > { %v204_v4 = vld [vmem:[%s1509_s17 + $0x10] sm:$0xff]  ;;  %v203_v8 = vld [vmem:[%s1509_s17 + $0x8] sm:$0xff]  ;;  %v1111_v10 = vld [vmem:[%s1509_s17 + $0x58] sm:$0xff]  ;;  %v230_v22 = vmin.f32 %v1105_v1, %v1110_v2  ;;  %v232_v28 = vmin.f32 %v1107_v5, %v1112_v6  ;;  %s1337_s16 = smov 112   ;;  %s1338_s27 = smov 125  }
  0x50   : > { %v227_v7 = vmin.f32 %v204_v4, %v1107_v5  ;;  %v1106_v9 = vld [vmem:[%s1509_s17 + $0x30] sm:$0xff]  ;;  %v1531_v11 = vmin.f32 %v225_v3, %v1110_v2  ;;  %v205_v13 = vld [vmem:[%s1509_s17 + $0x18] sm:$0xff]  ;;  %v1108_v14 = vld [vmem:[%s1509_s17 + $0x40] sm:$0xff]  ;;  %s1104_s23 = sshll.u32 %s1505_s14, 3  ;;  %s1136_s25 = sshll.u32 %s1376_s13, 7 }
  0x51   : > { %v226_v12 = vmin.f32 %v203_v8, %v1106_v9  ;;  %v1113_v15 = vld [vmem:[%s1509_s17 + $0x68] sm:$0xff]  ;;  %v228_v17 = vmin.f32 %v205_v13, %v1108_v14  ;;  %v206_v18 = vld [vmem:[%s1509_s17 + $0x20] sm:$0xff]  ;;  %v1114_v24 = vld [vmem:[%s1509_s17 + $0x70] sm:$0xff]  ;;  %v231_v27 = vmin.f32 %v1106_v9, %v1111_v10  ;;  %s201_s26 = scalar_lea.vmem [#allocation7], %s1104_s23  ;;  %s1003_s7 = scalar_lea.hbm %s2111_s2, %s1136_s25 }
  0x52   : > { %v1536_v16 = vmin.f32 %v227_v7, %v1112_v6  ;;  %v1109_v19 = vld [vmem:[%s1509_s17 + $0x48] sm:$0xff]  ;;  %288 = vrot.lane.b32.xlu0 %v1531_v11, %s1333_s19  ;;  %v1115_v25 = vld [vmem:[%s1509_s17 + $0x78] sm:$0xff]  ;;  %v1116_v30 = vld [vmem:[%s1509_s17 + $0x80] sm:$0xff]  ;;  %v233_v33 = vmin.f32 %v1108_v14, %v1113_v15  ;;  %s1005_s22 = sshll.u32 %s201_s26, 4  ;;  %s992_s30 = scalar_lea.sflag [#allocation4], %s1505_s14  ;;  %s1006_s22 = int_to_ptr.vmem [resolvable:$true] %s1005_s22 }
  0x53   : > { %v1542_v20 = vmin.f32 %v226_v12, %v1111_v10  ;;  %v229_v21 = vmin.f32 %v206_v18, %v1109_v19  ;;  %v1546_v23 = vmin.f32 %v228_v17, %v1113_v15  ;;  %v1556_v29 = vmin.f32 %v230_v22, %v1115_v25  ;;  %v1117_v31 = vld [vmem:[%s1509_s17 + $0x88] sm:$0xff]  ;;  %v1118_v35 = vld [vmem:[%s1509_s17 + $0x90] sm:$0xff]  ;;  %v245_v37 = vld [vmem:[%s1516_s29] sm:$0xff]  ;;  %s1259_s3 = scalar_lea.vmem %s1006_s22, 128  ;;  %p2120_p1 = scmp.ne.s32.totalorder %s2115_s20, 0 }
  0x54   : > { %292 = vrot.lane.b32.xlu1 %v1536_v16, %s1333_s19  ;;  %v1562_v32 = vmin.f32 %v231_v27, %v1116_v30  ;;  %v1566_v34 = vmin.f32 %v232_v28, %v1117_v31  ;;  %v234_v36 = vmin.f32 %v1109_v19, %v1114_v24  ;;  %v1120_v38 = vld [vmem:[%s1516_s29 + $0x28] sm:$0xff]  ;;  %v1119_v39 = vld [vmem:[%s1509_s17 + $0x98] sm:$0xff]  ;;  %v1121_v41 = vld [vmem:[%s1516_s29 + $0x30] sm:$0xff]  ;;  %v1576_v42 = vmin.f32 %v233_v33, %v1118_v35  ;;  %p1260_p13 = scmp.ne.s32.totalorder %s1006_s22, %s1259_s3  ;;  %s1339_s17 = smov [#allocation7]  }
  0x55   : > { %v1552_v26 = vmin.f32 %v229_v21, %v1114_v24  ;;  %v246_v40 = vld [vmem:[%s1516_s29 + $0x8] sm:$0xff]  ;;  %v268_v43 = vmin.f32 %v245_v37, %v1120_v38  ;;  %v1125_v45 = vld [vmem:[%s1516_s29 + $0x50] sm:$0xff]  ;;  %v1122_v48 = vld [vmem:[%s1516_s29 + $0x38] sm:$0xff]  ;;  %s1263_s28 = sshll.u32 %s1339_s17, 4  ;;  %s1264_s28 = int_to_ptr.vmem [resolvable:$false] %s1263_s28 }
  0x56   : > { %290 = vrot.lane.b32.xlu0 %v1542_v20, %s1333_s19  ;;  %v1580_v44 = vmin.f32 %v234_v36, %v1119_v39  ;;  %v269_v46 = vmin.f32 %v246_v40, %v1121_v41  ;;  %v247_v47 = vld [vmem:[%s1516_s29 + $0x10] sm:$0xff]  ;;  %v1126_v49 = vld [vmem:[%s1516_s29 + $0x58] sm:$0xff]  ;;  %v1123_v51 = vld [vmem:[%s1516_s29 + $0x40] sm:$0xff]  ;;  %v273_v0 = vmin.f32 %v1120_v38, %v1125_v45  ;;  %p1261_p12 = pnand %p1260_p13, %p2120_p1  ;;  %s1265_s13 = scalar_lea.vmem %s1264_s28, 256 }
  0x57   : > { %v248_v50 = vld [vmem:[%s1516_s29 + $0x18] sm:$0xff]  ;;  %v1590_v52 = vmin.f32 %v268_v43, %v1125_v45  ;;  %v270_v53 = vmin.f32 %v247_v47, %v1122_v48  ;;  %v1127_v55 = vld [vmem:[%s1516_s29 + $0x60] sm:$0xff]  ;;  %v1124_v58 = vld [vmem:[%s1516_s29 + $0x48] sm:$0xff]  ;;  %v274_v3 = vmin.f32 %v1121_v41, %v1126_v49  ;;  %p1266_p10 = scmp.lt.s32.totalorder %s1006_s22, %s1264_s28  ;;  %p1267_p0 = scmp.lt.s32.totalorder %s1265_s13, %s1259_s3 }
  0x58   : > { %294 = vrot.lane.b32.xlu1 %v1546_v23, %s1333_s19  ;;  %v1594_v54 = vmin.f32 %v269_v46, %v1126_v49  ;;  %v271_v56 = vmin.f32 %v248_v50, %v1123_v51  ;;  %v249_v57 = vld [vmem:[%s1516_s29 + $0x20] sm:$0xff]  ;;  %v1128_v59 = vld [vmem:[%s1516_s29 + $0x68] sm:$0xff]  ;;  %v1129_v63 = vld [vmem:[%s1516_s29 + $0x70] sm:$0xff]  ;;  %v275_v6 = vmin.f32 %v1122_v48, %v1127_v55  ;;  %p1262_p7 = pneg %p1261_p12 }
  0x59   : > { %v1602_v60 = vmin.f32 %v270_v53, %v1127_v55  ;;  %v272_v61 = vmin.f32 %v249_v57, %v1124_v58  ;;  %v1130_v1 = vld [vmem:[%s1516_s29 + $0x78] sm:$0xff]  ;;  %v1131_v5 = vld [vmem:[%s1516_s29 + $0x80] sm:$0xff]  ;;  %v1132_v7 = vld [vmem:[%s1516_s29 + $0x88] sm:$0xff]  ;;  %v276_v9 = vmin.f32 %v1123_v51, %v1128_v59  ;;  %v277_v13 = vmin.f32 %v1124_v58, %v1129_v63  ;;  %p1268_p2 = por %p1267_p0, %p1266_p10 }
  0x5a   : > { %296 = vrot.lane.b32.xlu0 %v1552_v26, %s1333_s19  ;;  %v1606_v62 = vmin.f32 %v271_v56, %v1128_v59  ;;  %v1616_v4 = vmin.f32 %v273_v0, %v1130_v1  ;;  %v284_v8 = vmin.f32 %v274_v3, %v1131_v5  ;;  %v1624_v10 = vmin.f32 %v275_v6, %v1132_v7  ;;  %v1133_v12 = vld [vmem:[%s1516_s29 + $0x90] sm:$0xff]  ;;  %v1134_v14 = vld [vmem:[%s1516_s29 + $0x98] sm:$0xff] }
  0x5b   : > { %v1612_v2 = vmin.f32 %v272_v61, %v1129_v63  ;;  %v286_v15 = vmin.f32 %v276_v9, %v1133_v12  ;;  %v287_v17 = vmin.f32 %v277_v13, %v1134_v14  ;;  %p1269_p4 = pnand %p1268_p2, %p1262_p7 }
  0x5c   : > { %298 = vrot.lane.b32.xlu1 %v1556_v29, %s1333_s19 }
  0x5e   : > { %300 = vrot.lane.b32.xlu0 %v1562_v32, %s1333_s19 }
  0x60   : > { %302 = vrot.lane.b32.xlu1 %v1566_v34, %s1333_s19 }
  0x62   : > { %304 = vrot.lane.b32.xlu0 %v1576_v42, %s1333_s19 }
  0x64   : > { %306 = vrot.lane.b32.xlu1 %v1580_v44, %s1333_s19 }
  0x66   : > { %308 = vrot.lane.b32.xlu0 %v1590_v52, %s1333_s19 }
  0x68   : > { %310 = vrot.lane.b32.xlu1 %v1594_v54, %s1333_s19 }
  0x6a   : > { %312 = vrot.lane.b32.xlu0 %v1602_v60, %s1333_s19 }
  0x6c   : > { %314 = vrot.lane.b32.xlu1 %v1606_v62, %s1333_s19 }
  0x6e   : > { %316 = vrot.lane.b32.xlu0 %v1612_v2, %s1333_s19 }
  0x70   : > { %318 = vrot.lane.b32.xlu1 %v1616_v4, %s1333_s19 }
  0x72   : > { %320 = vrot.lane.b32.xlu0 %v284_v8, %s1333_s19 }
  0x74   : > { %322 = vrot.lane.b32.xlu1 %v1624_v10, %s1333_s19 }
  0x76   : > { %324 = vrot.lane.b32.xlu0 %v286_v15, %s1333_s19 }
  0x78   : > { %326 = vrot.lane.b32.xlu1 %v287_v17, %s1333_s19 }
  0xc4   : > { %v289_v18 = vpop.permute.xlu0 %288 }
  0xc5   : > { %v328_v19 = vmax.f32 %v1531_v11, %v289_v18 }
  0xc6   : > { %v293_v21 = vpop.permute.xlu1 %292 }
  0xc7   : > { %348 = vrot.lane.b32.xlu0 %v328_v19, %s1334_s4  ;;  %v1636_v22 = vmax.f32 %v1536_v16, %v293_v21 }
  0xc8   : > { %v291_v24 = vpop.permute.xlu0 %290 }
  0xc9   : > { %v329_v25 = vmax.f32 %v1542_v20, %v291_v24 }
  0xca   : > { %v295_v27 = vpop.permute.xlu1 %294 }
  0xcb   : > { %352 = vrot.lane.b32.xlu0 %v1636_v22, %s1334_s4  ;;  %350 = vrot.lane.b32.xlu1 %v329_v25, %s1334_s4  ;;  %v331_v28 = vmax.f32 %v1546_v23, %v295_v27 }
  0xcc   : > { %v297_v30 = vpop.permute.xlu0 %296 }
  0xcd   : > { %v332_v11 = vmax.f32 %v1552_v26, %v297_v30 }
  0xce   : > { %v299_v31 = vpop.permute.xlu1 %298 }
  0xcf   : > { %354 = vrot.lane.b32.xlu1 %v331_v28, %s1334_s4  ;;  %356 = vrot.lane.b32.xlu0 %v332_v11, %s1334_s4  ;;  %v333_v16 = vmax.f32 %v1556_v29, %v299_v31 }
  0xd0   : > { %v301_v33 = vpop.permute.xlu0 %300 }
  0xd1   : > { %v334_v20 = vmax.f32 %v1562_v32, %v301_v33 }
  0xd2   : > { %v303_v35 = vpop.permute.xlu1 %302 }
  0xd3   : > { %358 = vrot.lane.b32.xlu1 %v333_v16, %s1334_s4  ;;  %360 = vrot.lane.b32.xlu0 %v334_v20, %s1334_s4  ;;  %v335_v23 = vmax.f32 %v1566_v34, %v303_v35 }
  0xd4   : > { %v305_v36 = vpop.permute.xlu0 %304 }
  0xd5   : > { %v336_v26 = vmax.f32 %v1576_v42, %v305_v36 }
  0xd6   : > { %v307_v37 = vpop.permute.xlu1 %306 }
  0xd7   : > { %362 = vrot.lane.b32.xlu1 %v335_v23, %s1334_s4  ;;  %364 = vrot.lane.b32.xlu0 %v336_v26, %s1334_s4  ;;  %v337_v29 = vmax.f32 %v1580_v44, %v307_v37 }
  0xd8   : > { %v309_v38 = vpop.permute.xlu0 %308 }
  0xd9   : > { %v338_v32 = vmax.f32 %v1590_v52, %v309_v38 }
  0xda   : > { %v311_v39 = vpop.permute.xlu1 %310 }
  0xdb   : > { %366 = vrot.lane.b32.xlu1 %v337_v29, %s1334_s4  ;;  %368 = vrot.lane.b32.xlu0 %v338_v32, %s1334_s4  ;;  %v339_v34 = vmax.f32 %v1594_v54, %v311_v39 }
  0xdc   : > { %v313_v40 = vpop.permute.xlu0 %312 }
  0xdd   : > { %v340_v41 = vmax.f32 %v1602_v60, %v313_v40 }
  0xde   : > { %v315_v42 = vpop.permute.xlu1 %314 }
  0xdf   : > { %370 = vrot.lane.b32.xlu1 %v339_v34, %s1334_s4  ;;  %372 = vrot.lane.b32.xlu0 %v340_v41, %s1334_s4  ;;  %v341_v43 = vmax.f32 %v1606_v62, %v315_v42 }
  0xe0   : > { %v317_v44 = vpop.permute.xlu0 %316 }
  0xe1   : > { %v342_v45 = vmax.f32 %v1612_v2, %v317_v44 }
  0xe2   : > { %v319_v46 = vpop.permute.xlu1 %318 }
  0xe3   : > { %374 = vrot.lane.b32.xlu1 %v341_v43, %s1334_s4  ;;  %376 = vrot.lane.b32.xlu0 %v342_v45, %s1334_s4  ;;  %v343_v47 = vmax.f32 %v1616_v4, %v319_v46 }
  0xe4   : > { %v321_v48 = vpop.permute.xlu0 %320 }
  0xe5   : > { %v344_v49 = vmax.f32 %v284_v8, %v321_v48 }
  0xe6   : > { %v323_v50 = vpop.permute.xlu1 %322 }
  0xe7   : > { %378 = vrot.lane.b32.xlu1 %v343_v47, %s1334_s4  ;;  %380 = vrot.lane.b32.xlu0 %v344_v49, %s1334_s4  ;;  %v345_v51 = vmax.f32 %v1624_v10, %v323_v50 }
  0xe8   : > { %v325_v52 = vpop.permute.xlu0 %324 }
  0xe9   : > { %v346_v53 = vmax.f32 %v286_v15, %v325_v52 }
  0xea   : > { %v327_v54 = vpop.permute.xlu1 %326 }
  0xeb   : > { %382 = vrot.lane.b32.xlu1 %v345_v51, %s1334_s4  ;;  %384 = vrot.lane.b32.xlu0 %v346_v53, %s1334_s4  ;;  %v347_v55 = vmax.f32 %v287_v17, %v327_v54 }
  0xef   : > { %386 = vrot.lane.b32.xlu1 %v347_v55, %s1334_s4 }
 0x139   : > { %v349_v56 = vpop.permute.xlu0 %348 }
 0x13a   : > { %v388_v57 = vmax.f32 %v328_v19, %v349_v56 }
 0x13c   : > { %408 = vrot.lane.b32.xlu0 %v388_v57, %s1335_s5 }
 0x13d   : > { %v351_v58 = vpop.permute.xlu1 %350  ;;  %v353_v59 = vpop.permute.xlu0 %352 }
 0x13e   : > { %v389_v60 = vmax.f32 %v329_v25, %v351_v58  ;;  %v390_v61 = vmax.f32 %v1636_v22, %v353_v59 }
 0x140   : > { %410 = vrot.lane.b32.xlu1 %v389_v60, %s1335_s5  ;;  %412 = vrot.lane.b32.xlu0 %v390_v61, %s1335_s5 }
 0x141   : > { %v355_v62 = vpop.permute.xlu1 %354  ;;  %v357_v63 = vpop.permute.xlu0 %356 }
 0x142   : > { %v391_v0 = vmax.f32 %v331_v28, %v355_v62  ;;  %v392_v1 = vmax.f32 %v332_v11, %v357_v63 }
 0x144   : > { %414 = vrot.lane.b32.xlu1 %v391_v0, %s1335_s5  ;;  %416 = vrot.lane.b32.xlu0 %v392_v1, %s1335_s5 }
 0x145   : > { %v359_v2 = vpop.permute.xlu1 %358  ;;  %v361_v3 = vpop.permute.xlu0 %360 }
 0x146   : > { %v393_v4 = vmax.f32 %v333_v16, %v359_v2  ;;  %v394_v5 = vmax.f32 %v334_v20, %v361_v3 }
 0x148   : > { %418 = vrot.lane.b32.xlu1 %v393_v4, %s1335_s5  ;;  %420 = vrot.lane.b32.xlu0 %v394_v5, %s1335_s5 }
 0x149   : > { %v363_v6 = vpop.permute.xlu1 %362  ;;  %v365_v7 = vpop.permute.xlu0 %364 }
 0x14a   : > { %v395_v8 = vmax.f32 %v335_v23, %v363_v6  ;;  %v396_v9 = vmax.f32 %v336_v26, %v365_v7 }
 0x14c   : > { %422 = vrot.lane.b32.xlu1 %v395_v8, %s1335_s5  ;;  %424 = vrot.lane.b32.xlu0 %v396_v9, %s1335_s5 }
 0x14d   : > { %v367_v10 = vpop.permute.xlu1 %366  ;;  %v369_v12 = vpop.permute.xlu0 %368 }
 0x14e   : > { %v397_v13 = vmax.f32 %v337_v29, %v367_v10  ;;  %v398_v14 = vmax.f32 %v338_v32, %v369_v12 }
 0x150   : > { %426 = vrot.lane.b32.xlu1 %v397_v13, %s1335_s5  ;;  %428 = vrot.lane.b32.xlu0 %v398_v14, %s1335_s5 }
 0x151   : > { %v371_v15 = vpop.permute.xlu1 %370  ;;  %v373_v17 = vpop.permute.xlu0 %372 }
 0x152   : > { %v399_v18 = vmax.f32 %v339_v34, %v371_v15  ;;  %v400_v19 = vmax.f32 %v340_v41, %v373_v17 }
 0x154   : > { %430 = vrot.lane.b32.xlu1 %v399_v18, %s1335_s5  ;;  %432 = vrot.lane.b32.xlu0 %v400_v19, %s1335_s5 }
 0x155   : > { %v375_v21 = vpop.permute.xlu1 %374  ;;  %v377_v22 = vpop.permute.xlu0 %376 }
 0x156   : > { %v401_v24 = vmax.f32 %v341_v43, %v375_v21  ;;  %v402_v25 = vmax.f32 %v342_v45, %v377_v22 }
 0x158   : > { %434 = vrot.lane.b32.xlu1 %v401_v24, %s1335_s5  ;;  %436 = vrot.lane.b32.xlu0 %v402_v25, %s1335_s5 }
 0x159   : > { %v379_v27 = vpop.permute.xlu1 %378  ;;  %v381_v28 = vpop.permute.xlu0 %380 }
 0x15a   : > { %v403_v30 = vmax.f32 %v343_v47, %v379_v27  ;;  %v404_v11 = vmax.f32 %v344_v49, %v381_v28 }
 0x15c   : > { %438 = vrot.lane.b32.xlu1 %v403_v30, %s1335_s5  ;;  %440 = vrot.lane.b32.xlu0 %v404_v11, %s1335_s5 }
 0x15d   : > { %v383_v31 = vpop.permute.xlu1 %382  ;;  %v385_v16 = vpop.permute.xlu0 %384 }
 0x15e   : > { %v405_v33 = vmax.f32 %v345_v51, %v383_v31  ;;  %v406_v20 = vmax.f32 %v346_v53, %v385_v16 }
 0x160   : > { %442 = vrot.lane.b32.xlu1 %v405_v33, %s1335_s5  ;;  %444 = vrot.lane.b32.xlu0 %v406_v20, %s1335_s5 }
 0x161   : > { %v387_v35 = vpop.permute.xlu1 %386 }
 0x162   : > { %v407_v23 = vmax.f32 %v347_v55, %v387_v35 }
 0x164   : > { %446 = vrot.lane.b32.xlu1 %v407_v23, %s1335_s5 }
 0x1ae   : > { %v409_v36 = vpop.permute.xlu0 %408 }
 0x1af   : > { %v448_v26 = vmax.f32 %v388_v57, %v409_v36 }
 0x1b1   : > { %468 = vrot.lane.b32.xlu0 %v448_v26, %s1336_s8 }
 0x1b2   : > { %v411_v37 = vpop.permute.xlu1 %410  ;;  %v413_v29 = vpop.permute.xlu0 %412 }
 0x1b3   : > { %v449_v38 = vmax.f32 %v389_v60, %v411_v37  ;;  %v450_v32 = vmax.f32 %v390_v61, %v413_v29 }
 0x1b5   : > { %470 = vrot.lane.b32.xlu1 %v449_v38, %s1336_s8  ;;  %472 = vrot.lane.b32.xlu0 %v450_v32, %s1336_s8 }
 0x1b6   : > { %v415_v39 = vpop.permute.xlu1 %414  ;;  %v417_v34 = vpop.permute.xlu0 %416 }
 0x1b7   : > { %v451_v40 = vmax.f32 %v391_v0, %v415_v39  ;;  %v452_v41 = vmax.f32 %v392_v1, %v417_v34 }
 0x1b9   : > { %474 = vrot.lane.b32.xlu1 %v451_v40, %s1336_s8  ;;  %476 = vrot.lane.b32.xlu0 %v452_v41, %s1336_s8 }
 0x1ba   : > { %v419_v42 = vpop.permute.xlu1 %418  ;;  %v421_v43 = vpop.permute.xlu0 %420 }
 0x1bb   : > { %v453_v44 = vmax.f32 %v393_v4, %v419_v42  ;;  %v454_v45 = vmax.f32 %v394_v5, %v421_v43 }
 0x1bd   : > { %478 = vrot.lane.b32.xlu1 %v453_v44, %s1336_s8  ;;  %480 = vrot.lane.b32.xlu0 %v454_v45, %s1336_s8 }
 0x1be   : > { %v423_v46 = vpop.permute.xlu1 %422  ;;  %v425_v47 = vpop.permute.xlu0 %424 }
 0x1bf   : > { %v455_v48 = vmax.f32 %v395_v8, %v423_v46  ;;  %v456_v49 = vmax.f32 %v396_v9, %v425_v47 }
 0x1c1   : > { %482 = vrot.lane.b32.xlu1 %v455_v48, %s1336_s8  ;;  %484 = vrot.lane.b32.xlu0 %v456_v49, %s1336_s8 }
 0x1c2   : > { %v427_v50 = vpop.permute.xlu1 %426  ;;  %v429_v51 = vpop.permute.xlu0 %428 }
 0x1c3   : > { %v457_v52 = vmax.f32 %v397_v13, %v427_v50  ;;  %v458_v53 = vmax.f32 %v398_v14, %v429_v51 }
 0x1c5   : > { %486 = vrot.lane.b32.xlu1 %v457_v52, %s1336_s8  ;;  %488 = vrot.lane.b32.xlu0 %v458_v53, %s1336_s8 }
 0x1c6   : > { %v431_v54 = vpop.permute.xlu1 %430  ;;  %v433_v55 = vpop.permute.xlu0 %432 }
 0x1c7   : > { %v459_v56 = vmax.f32 %v399_v18, %v431_v54  ;;  %v460_v57 = vmax.f32 %v400_v19, %v433_v55 }
 0x1c9   : > { %490 = vrot.lane.b32.xlu1 %v459_v56, %s1336_s8  ;;  %492 = vrot.lane.b32.xlu0 %v460_v57, %s1336_s8 }
 0x1ca   : > { %v435_v58 = vpop.permute.xlu1 %434  ;;  %v437_v59 = vpop.permute.xlu0 %436 }
 0x1cb   : > { %v461_v60 = vmax.f32 %v401_v24, %v435_v58  ;;  %v462_v61 = vmax.f32 %v402_v25, %v437_v59 }
 0x1cd   : > { %494 = vrot.lane.b32.xlu1 %v461_v60, %s1336_s8  ;;  %496 = vrot.lane.b32.xlu0 %v462_v61, %s1336_s8 }
 0x1ce   : > { %v439_v62 = vpop.permute.xlu1 %438  ;;  %v441_v63 = vpop.permute.xlu0 %440 }
 0x1cf   : > { %v463_v0 = vmax.f32 %v403_v30, %v439_v62  ;;  %v464_v1 = vmax.f32 %v404_v11, %v441_v63 }
 0x1d1   : > { %498 = vrot.lane.b32.xlu1 %v463_v0, %s1336_s8  ;;  %500 = vrot.lane.b32.xlu0 %v464_v1, %s1336_s8 }
 0x1d2   : > { %v443_v2 = vpop.permute.xlu1 %442  ;;  %v445_v3 = vpop.permute.xlu0 %444 }
 0x1d3   : > { %v465_v4 = vmax.f32 %v405_v33, %v443_v2  ;;  %v466_v5 = vmax.f32 %v406_v20, %v445_v3 }
 0x1d5   : > { %502 = vrot.lane.b32.xlu1 %v465_v4, %s1336_s8  ;;  %504 = vrot.lane.b32.xlu0 %v466_v5, %s1336_s8 }
 0x1d6   : > { %v447_v6 = vpop.permute.xlu1 %446 }
 0x1d7   : > { %v467_v7 = vmax.f32 %v407_v23, %v447_v6 }
 0x1d9   : > { %506 = vrot.lane.b32.xlu1 %v467_v7, %s1336_s8 }
 0x223   : > { %v469_v8 = vpop.permute.xlu0 %468 }
 0x224   : > { %v508_v9 = vmax.f32 %v448_v26, %v469_v8 }
 0x226   : > { %528 = vrot.lane.b32.xlu0 %v508_v9, %s1337_s16 }
 0x227   : > { %v471_v10 = vpop.permute.xlu1 %470  ;;  %v473_v12 = vpop.permute.xlu0 %472 }
 0x228   : > { %v509_v13 = vmax.f32 %v449_v38, %v471_v10  ;;  %v510_v14 = vmax.f32 %v450_v32, %v473_v12 }
 0x22a   : > { %530 = vrot.lane.b32.xlu1 %v509_v13, %s1337_s16  ;;  %532 = vrot.lane.b32.xlu0 %v510_v14, %s1337_s16 }
 0x22b   : > { %v475_v15 = vpop.permute.xlu1 %474  ;;  %v477_v17 = vpop.permute.xlu0 %476 }
 0x22c   : > { %v511_v18 = vmax.f32 %v451_v40, %v475_v15  ;;  %v512_v19 = vmax.f32 %v452_v41, %v477_v17 }
 0x22e   : > { %534 = vrot.lane.b32.xlu1 %v511_v18, %s1337_s16  ;;  %536 = vrot.lane.b32.xlu0 %v512_v19, %s1337_s16 }
 0x22f   : > { %v479_v21 = vpop.permute.xlu1 %478  ;;  %v481_v22 = vpop.permute.xlu0 %480 }
 0x230   : > { %v513_v24 = vmax.f32 %v453_v44, %v479_v21  ;;  %v514_v25 = vmax.f32 %v454_v45, %v481_v22 }
 0x232   : > { %538 = vrot.lane.b32.xlu1 %v513_v24, %s1337_s16  ;;  %540 = vrot.lane.b32.xlu0 %v514_v25, %s1337_s16 }
 0x233   : > { %v483_v27 = vpop.permute.xlu1 %482  ;;  %v485_v28 = vpop.permute.xlu0 %484 }
 0x234   : > { %v515_v30 = vmax.f32 %v455_v48, %v483_v27  ;;  %v516_v11 = vmax.f32 %v456_v49, %v485_v28 }
 0x236   : > { %542 = vrot.lane.b32.xlu1 %v515_v30, %s1337_s16  ;;  %544 = vrot.lane.b32.xlu0 %v516_v11, %s1337_s16 }
 0x237   : > { %v487_v31 = vpop.permute.xlu1 %486  ;;  %v489_v16 = vpop.permute.xlu0 %488 }
 0x238   : > { %v517_v33 = vmax.f32 %v457_v52, %v487_v31  ;;  %v518_v20 = vmax.f32 %v458_v53, %v489_v16 }
 0x23a   : > { %546 = vrot.lane.b32.xlu1 %v517_v33, %s1337_s16  ;;  %548 = vrot.lane.b32.xlu0 %v518_v20, %s1337_s16 }
 0x23b   : > { %v491_v35 = vpop.permute.xlu1 %490  ;;  %v493_v23 = vpop.permute.xlu0 %492 }
 0x23c   : > { %v519_v36 = vmax.f32 %v459_v56, %v491_v35  ;;  %v520_v26 = vmax.f32 %v460_v57, %v493_v23 }
 0x23e   : > { %550 = vrot.lane.b32.xlu1 %v519_v36, %s1337_s16  ;;  %552 = vrot.lane.b32.xlu0 %v520_v26, %s1337_s16 }
 0x23f   : > { %v495_v37 = vpop.permute.xlu1 %494  ;;  %v497_v29 = vpop.permute.xlu0 %496 }
 0x240   : > { %v521_v38 = vmax.f32 %v461_v60, %v495_v37  ;;  %v522_v32 = vmax.f32 %v462_v61, %v497_v29 }
 0x242   : > { %554 = vrot.lane.b32.xlu1 %v521_v38, %s1337_s16  ;;  %556 = vrot.lane.b32.xlu0 %v522_v32, %s1337_s16 }
 0x243   : > { %v499_v39 = vpop.permute.xlu1 %498  ;;  %v501_v34 = vpop.permute.xlu0 %500 }
 0x244   : > { %v523_v40 = vmax.f32 %v463_v0, %v499_v39  ;;  %v524_v41 = vmax.f32 %v464_v1, %v501_v34 }
 0x246   : > { %558 = vrot.lane.b32.xlu1 %v523_v40, %s1337_s16  ;;  %560 = vrot.lane.b32.xlu0 %v524_v41, %s1337_s16 }
 0x247   : > { %v503_v42 = vpop.permute.xlu1 %502  ;;  %v505_v43 = vpop.permute.xlu0 %504 }
 0x248   : > { %v525_v44 = vmax.f32 %v465_v4, %v503_v42  ;;  %v526_v45 = vmax.f32 %v466_v5, %v505_v43 }
 0x24a   : > { %562 = vrot.lane.b32.xlu1 %v525_v44, %s1337_s16  ;;  %564 = vrot.lane.b32.xlu0 %v526_v45, %s1337_s16 }
 0x24b   : > { %v507_v46 = vpop.permute.xlu1 %506 }
 0x24c   : > { %v527_v47 = vmax.f32 %v467_v7, %v507_v46 }
 0x24e   : > { %566 = vrot.lane.b32.xlu1 %v527_v47, %s1337_s16 }
 0x298   : > { %v529_v48 = vpop.permute.xlu0 %528 }
 0x299   : > { %v1734_v49 = vmax.f32 %v508_v9, %v529_v48 }
 0x29b   : > { %588 = vrot.lane.b32.xlu0 %v1734_v49, %s1338_s27 }
 0x29c   : > { %v531_v50 = vpop.permute.xlu1 %530  ;;  %v533_v51 = vpop.permute.xlu0 %532 }
 0x29d   : > { %v569_v52 = vmax.f32 %v509_v13, %v531_v50  ;;  %v570_v53 = vmax.f32 %v510_v14, %v533_v51 }
 0x29f   : > { %590 = vrot.lane.b32.xlu1 %v569_v52, %s1338_s27  ;;  %592 = vrot.lane.b32.xlu0 %v570_v53, %s1338_s27 }
 0x2a0   : > { %v535_v54 = vpop.permute.xlu1 %534  ;;  %v537_v55 = vpop.permute.xlu0 %536 }
 0x2a1   : > { %v1740_v56 = vmax.f32 %v511_v18, %v535_v54  ;;  %v1742_v57 = vmax.f32 %v512_v19, %v537_v55 }
 0x2a3   : > { %594 = vrot.lane.b32.xlu1 %v1740_v56, %s1338_s27  ;;  %596 = vrot.lane.b32.xlu0 %v1742_v57, %s1338_s27 }
 0x2a4   : > { %v539_v58 = vpop.permute.xlu1 %538  ;;  %v541_v59 = vpop.permute.xlu0 %540 }
 0x2a5   : > { %v1748_v60 = vmax.f32 %v513_v24, %v539_v58  ;;  %v1750_v61 = vmax.f32 %v514_v25, %v541_v59 }
 0x2a7   : > { %598 = vrot.lane.b32.xlu1 %v1748_v60, %s1338_s27  ;;  %600 = vrot.lane.b32.xlu0 %v1750_v61, %s1338_s27 }
 0x2a8   : > { %v543_v62 = vpop.permute.xlu1 %542  ;;  %v545_v63 = vpop.permute.xlu0 %544 }
 0x2a9   : > { %v1756_v0 = vmax.f32 %v515_v30, %v543_v62  ;;  %v1758_v1 = vmax.f32 %v516_v11, %v545_v63  ;;  %v668_v30 = vlaneseq }
 0x2ab   : > { %602 = vrot.lane.b32.xlu1 %v1756_v0, %s1338_s27  ;;  %604 = vrot.lane.b32.xlu0 %v1758_v1, %s1338_s27  ;;  %v1809_v31 = vshrl.u32 %v668_v30, 7 }
 0x2ac   : > { %v547_v2 = vpop.permute.xlu1 %546  ;;  %v549_v3 = vpop.permute.xlu0 %548 }
 0x2ad   : > { %v1764_v4 = vmax.f32 %v517_v33, %v547_v2  ;;  %v1766_v5 = vmax.f32 %v518_v20, %v549_v3  ;;  %vm670_vm0 = vcmp.lt.s32.totalorder %v1809_v31, 7  ;;  %vm731_vm1 = vcmp.lt.s32.totalorder %v1809_v31, 6 }
 0x2ae   : > { %vm792_vm2 = vcmp.lt.s32.totalorder %v1809_v31, 4  ;;  %vm893_vm3 = vcmp.lt.s32.totalorder %v1809_v31, 5 }
 0x2af   : > { %606 = vrot.lane.b32.xlu1 %v1764_v4, %s1338_s27  ;;  %608 = vrot.lane.b32.xlu0 %v1766_v5, %s1338_s27 }
 0x2b0   : > { %v551_v6 = vpop.permute.xlu1 %550  ;;  %v553_v7 = vpop.permute.xlu0 %552 }
 0x2b1   : > { %v1772_v8 = vmax.f32 %v519_v36, %v551_v6  ;;  %v1774_v9 = vmax.f32 %v520_v26, %v553_v7 }
 0x2b3   : > { %610 = vrot.lane.b32.xlu1 %v1772_v8, %s1338_s27  ;;  %612 = vrot.lane.b32.xlu0 %v1774_v9, %s1338_s27 }
 0x2b4   : > { %v555_v10 = vpop.permute.xlu1 %554  ;;  %v557_v12 = vpop.permute.xlu0 %556 }
 0x2b5   : > { %v1780_v13 = vmax.f32 %v521_v38, %v555_v10  ;;  %v1782_v14 = vmax.f32 %v522_v32, %v557_v12 }
 0x2b7   : > { %614 = vrot.lane.b32.xlu1 %v1780_v13, %s1338_s27  ;;  %616 = vrot.lane.b32.xlu0 %v1782_v14, %s1338_s27 }
 0x2b8   : > { %v559_v15 = vpop.permute.xlu1 %558  ;;  %v561_v17 = vpop.permute.xlu0 %560 }
 0x2b9   : > { %v1788_v18 = vmax.f32 %v523_v40, %v559_v15  ;;  %v1790_v19 = vmax.f32 %v524_v41, %v561_v17 }
 0x2bb   : > { %618 = vrot.lane.b32.xlu1 %v1788_v18, %s1338_s27  ;;  %620 = vrot.lane.b32.xlu0 %v1790_v19, %s1338_s27 }
 0x2bc   : > { %v563_v21 = vpop.permute.xlu1 %562  ;;  %v565_v22 = vpop.permute.xlu0 %564 }
 0x2bd   : > { %v1796_v24 = vmax.f32 %v525_v44, %v563_v21  ;;  %v1798_v25 = vmax.f32 %v526_v45, %v565_v22 }
 0x2bf   : > { %622 = vrot.lane.b32.xlu1 %v1796_v24, %s1338_s27  ;;  %624 = vrot.lane.b32.xlu0 %v1798_v25, %s1338_s27 }
 0x2c0   : > { %v567_v27 = vpop.permute.xlu1 %566 }
 0x2c1   : > { %v1804_v28 = vmax.f32 %v527_v47, %v567_v27 }
 0x2c3   : > { %626 = vrot.lane.b32.xlu1 %v1804_v28, %s1338_s27 }
 0x30d   : > { %v589_v11 = vpop.permute.xlu0 %588 }
 0x30e   : > { %v1812_v16 = vmax.f32 %v1734_v49, %v589_v11 }
 0x310   : > { %v648_v36 = vrot.slane %v1812_v16, 1 }
 0x311   : > { %v591_v33 = vpop.permute.xlu1 %590  ;;  %v593_v20 = vpop.permute.xlu0 %592 }
 0x312   : > { %v629_v35 = vmax.f32 %v569_v52, %v591_v33  ;;  %v630_v23 = vmax.f32 %v570_v53, %v593_v20 }
 0x314   : > { %v649_v26 = vrot.slane %v629_v35, 1  ;;  %v650_v37 = vrot.slane %v630_v23, 1 }
 0x315   : > { %v595_v29 = vpop.permute.xlu1 %594  ;;  %v597_v38 = vpop.permute.xlu0 %596 }
 0x316   : > { %v689_v32 = vsel %vm670_vm0, %v648_v36, %v649_v26  ;;  %v688_v39 = vsel %vm670_vm0, %v649_v26, %v650_v37  ;;  %v631_v34 = vmax.f32 %v1740_v56, %v595_v29  ;;  %v632_v40 = vmax.f32 %v1742_v57, %v597_v38 }
 0x317   : > { %v1825_v41 = vmax.f32 %v1812_v16, %v689_v32  ;;  %v692_v42 = vmax.f32 %v629_v35, %v688_v39 }
 0x318   : > { %v651_v43 = vrot.slane %v631_v34, 1  ;;  %v652_v44 = vrot.slane %v632_v40, 1 }
 0x319   : > { %v712_v45 = vrot.slane %v692_v42, 2  ;;  %v599_v46 = vpop.permute.xlu1 %598  ;;  %v601_v47 = vpop.permute.xlu0 %600  ;;  %v711_v48 = vrot.slane %v1825_v41, 2 }
 0x31a   : > { %v687_v49 = vsel %vm670_vm0, %v650_v37, %v651_v43  ;;  %v686_v50 = vsel %vm670_vm0, %v651_v43, %v652_v44  ;;  %v633_v51 = vmax.f32 %v1748_v60, %v599_v46  ;;  %v634_v52 = vmax.f32 %v1750_v61, %v601_v47 }
 0x31b   : > { %v693_v53 = vmax.f32 %v630_v23, %v687_v49  ;;  %v694_v54 = vmax.f32 %v631_v34, %v686_v50  ;;  %v750_v55 = vsel %vm731_vm1, %v711_v48, %v712_v45 }
 0x31c   : > { %v653_v56 = vrot.slane %v633_v51, 1  ;;  %v654_v57 = vrot.slane %v634_v52, 1  ;;  %v1840_v2 = vmax.f32 %v1825_v41, %v750_v55 }
 0x31d   : > { %v713_v58 = vrot.slane %v693_v53, 2  ;;  %v714_v59 = vrot.slane %v694_v54, 2  ;;  %v603_v62 = vpop.permute.xlu1 %602  ;;  %v605_v63 = vpop.permute.xlu0 %604 }
 0x31e   : > { %v685_v60 = vsel %vm670_vm0, %v652_v44, %v653_v56  ;;  %v684_v61 = vsel %vm670_vm0, %v653_v56, %v654_v57  ;;  %v635_v3 = vmax.f32 %v1756_v0, %v603_v62  ;;  %v636_v6 = vmax.f32 %v1758_v1, %v605_v63 }
 0x31f   : > { %v749_v7 = vsel %vm731_vm1, %v712_v45, %v713_v58  ;;  %v748_v10 = vsel %vm731_vm1, %v713_v58, %v714_v59  ;;  %v695_v12 = vmax.f32 %v632_v40, %v685_v60  ;;  %v696_v15 = vmax.f32 %v633_v51, %v684_v61 }
 0x320   : > { %v1852_v17 = vmax.f32 %v692_v42, %v749_v7  ;;  %v1854_v21 = vmax.f32 %v693_v53, %v748_v10  ;;  %v655_v22 = vrot.slane %v635_v3, 1  ;;  %v656_v27 = vrot.slane %v636_v6, 1 }
 0x321   : > { %v715_v11 = vrot.slane %v695_v12, 2  ;;  %v716_v0 = vrot.slane %v696_v15, 2  ;;  %v607_v33 = vpop.permute.xlu1 %606  ;;  %v609_v1 = vpop.permute.xlu0 %608  ;;  %v772_v20 = vrot.slane %v1840_v2, 4 }
 0x322   : > { %v773_v35 = vrot.slane %v1852_v17, 4  ;;  %v774_v23 = vrot.slane %v1854_v21, 4  ;;  %v683_v26 = vsel %vm670_vm0, %v654_v57, %v655_v22  ;;  %v682_v37 = vsel %vm670_vm0, %v655_v22, %v656_v27 }
 0x323   : > { %v747_v29 = vsel %vm731_vm1, %v714_v59, %v715_v11  ;;  %v746_v38 = vsel %vm731_vm1, %v715_v11, %v716_v0  ;;  %v697_v32 = vmax.f32 %v634_v52, %v683_v26  ;;  %v698_v39 = vmax.f32 %v635_v3, %v682_v37 }
 0x324   : > { %v1868_v34 = vmax.f32 %v694_v54, %v747_v29  ;;  %v1870_v40 = vmax.f32 %v695_v12, %v746_v38  ;;  %v637_v42 = vmax.f32 %v1764_v4, %v607_v33  ;;  %v638_v43 = vmax.f32 %v1766_v5, %v609_v1 }
 0x325   : > { %v717_v44 = vrot.slane %v697_v32, 2  ;;  %v718_v45 = vrot.slane %v698_v39, 2  ;;  %v611_v46 = vpop.permute.xlu1 %610  ;;  %v613_v47 = vpop.permute.xlu0 %612  ;;  %v1876_v49 = vsel %vm792_vm2, %v773_v35, %v774_v23  ;;  %v1882_v50 = vsel %vm792_vm2, %v772_v20, %v773_v35 }
 0x326   : > { %v775_v51 = vrot.slane %v1868_v34, 4  ;;  %v776_v4 = vrot.slane %v1870_v40, 4  ;;  %v657_v52 = vrot.slane %v637_v42, 1  ;;  %v658_v5 = vrot.slane %v638_v43, 1 }
 0x327   : > { %v745_v53 = vsel %vm731_vm1, %v716_v0, %v717_v44  ;;  %v744_v54 = vsel %vm731_vm1, %v717_v44, %v718_v45  ;;  %v639_v55 = vmax.f32 %v1772_v8, %v611_v46  ;;  %v640_v56 = vmax.f32 %v1774_v9, %v613_v47 }
 0x328   : > { %v1894_v57 = vsel %vm792_vm2, %v774_v23, %v775_v51  ;;  %v1898_v58 = vsel %vm792_vm2, %v775_v51, %v776_v4  ;;  %v1900_v59 = vmax.f32 %v696_v15, %v745_v53  ;;  %v1902_v62 = vmax.f32 %v697_v32, %v744_v54 }
 0x329   : > { %v681_v63 = vsel %vm670_vm0, %v656_v27, %v657_v52  ;;  %v680_v8 = vsel %vm670_vm0, %v657_v52, %v658_v5  ;;  %v659_v60 = vrot.slane %v639_v55, 1  ;;  %v660_v9 = vrot.slane %v640_v56, 1  ;;  %v615_v61 = vpop.permute.xlu1 %614  ;;  %v617_v3 = vpop.permute.xlu0 %616 }
 0x32a   : > { %v777_v7 = vrot.slane %v1900_v59, 4  ;;  %v778_v10 = vrot.slane %v1902_v62, 4  ;;  %v699_v12 = vmax.f32 %v636_v6, %v681_v63  ;;  %v700_v22 = vmax.f32 %v637_v42, %v680_v8 }
 0x32b   : > { %v679_v15 = vsel %vm670_vm0, %v658_v5, %v659_v60  ;;  %v678_v11 = vsel %vm670_vm0, %v659_v60, %v660_v9  ;;  %v641_v27 = vmax.f32 %v1780_v13, %v615_v61  ;;  %v642_v0 = vmax.f32 %v1782_v14, %v617_v3 }
 0x32c   : > { %v1918_v33 = vsel %vm792_vm2, %v776_v4, %v777_v7  ;;  %v1922_v1 = vsel %vm792_vm2, %v777_v7, %v778_v10  ;;  %v719_v6 = vrot.slane %v699_v12, 2  ;;  %v720_v35 = vrot.slane %v700_v22, 2 }
 0x32d   : > { %v817_v23 = vmax.f32 %v1870_v40, %v1918_v33  ;;  %v701_v26 = vmax.f32 %v638_v43, %v679_v15  ;;  %v702_v37 = vmax.f32 %v639_v55, %v678_v11  ;;  %v661_v29 = vrot.slane %v641_v27, 1  ;;  %v619_v38 = vpop.permute.xlu1 %618  ;;  %v621_v13 = vpop.permute.xlu0 %620 }
 0x32e   : > { %v743_v14 = vsel %vm731_vm1, %v718_v45, %v719_v6  ;;  %v742_v32 = vsel %vm731_vm1, %v719_v6, %v720_v35  ;;  %v662_v42 = vrot.slane %v642_v0, 1  ;;  %v643_v44 = vmax.f32 %v1788_v18, %v619_v38 }
 0x32f   : > { %v1931_v46 = vmax.f32 %v698_v39, %v743_v14  ;;  %v1933_v47 = vmax.f32 %v699_v12, %v742_v32  ;;  %v721_v51 = vrot.slane %v701_v26, 2  ;;  %v722_v4 = vrot.slane %v702_v37, 2 }
 0x330   : > { %v677_v43 = vsel %vm670_vm0, %v660_v9, %v661_v29  ;;  %v676_v52 = vsel %vm670_vm0, %v661_v29, %v662_v42  ;;  %v663_v5 = vrot.slane %v643_v44, 1  ;;  %v644_v45 = vmax.f32 %v1790_v19, %v621_v13 }
 0x331   : > { %v779_v53 = vrot.slane %v1931_v46, 4  ;;  %v780_v54 = vrot.slane %v1933_v47, 4  ;;  %v741_v18 = vsel %vm731_vm1, %v720_v35, %v721_v51  ;;  %v740_v39 = vsel %vm731_vm1, %v721_v51, %v722_v4  ;;  %v623_v55 = vpop.permute.xlu1 %622  ;;  %v625_v61 = vpop.permute.xlu0 %624 }
 0x332   : > { %v1946_v63 = vmax.f32 %v700_v22, %v741_v18  ;;  %v1948_v8 = vmax.f32 %v701_v26, %v740_v39  ;;  %v703_v60 = vmax.f32 %v640_v56, %v677_v43  ;;  %v704_v9 = vmax.f32 %v641_v27, %v676_v52 }
 0x333   : > { %v805_v19 = vsel %vm792_vm2, %v778_v10, %v779_v53  ;;  %v1954_v3 = vsel %vm792_vm2, %v779_v53, %v780_v54  ;;  %v675_v7 = vsel %vm670_vm0, %v662_v42, %v663_v5  ;;  %v664_v12 = vrot.slane %v644_v45, 1 }
 0x334   : > { %v781_v15 = vrot.slane %v1946_v63, 4  ;;  %v782_v22 = vrot.slane %v1948_v8, 4  ;;  %v723_v11 = vrot.slane %v703_v60, 2  ;;  %v724_v6 = vrot.slane %v704_v9, 2 }
 0x335   : > { %v705_v56 = vmax.f32 %v642_v0, %v675_v7  ;;  %v674_v27 = vsel %vm670_vm0, %v663_v5, %v664_v12  ;;  %v645_v10 = vmax.f32 %v1796_v24, %v623_v55  ;;  %v646_v35 = vmax.f32 %v1798_v25, %v625_v61  ;;  %v627_v26 = vpop.permute.xlu1 %626 }
 0x336   : > { %v803_v29 = vsel %vm792_vm2, %v780_v54, %v781_v15  ;;  %v1968_v38 = vsel %vm792_vm2, %v781_v15, %v782_v22  ;;  %v739_v13 = vsel %vm731_vm1, %v722_v4, %v723_v11  ;;  %v738_v0 = vsel %vm731_vm1, %v723_v11, %v724_v6 }
 0x337   : > { %v822_v14 = vmax.f32 %v1946_v63, %v1968_v38  ;;  %v763_v24 = vmax.f32 %v702_v37, %v739_v13  ;;  %v764_v32 = vmax.f32 %v703_v60, %v738_v0  ;;  %v725_v25 = vrot.slane %v705_v56, 2 }
 0x338   : > { %v706_v42 = vmax.f32 %v643_v44, %v674_v27  ;;  %v665_v51 = vrot.slane %v645_v10, 1  ;;  %v666_v43 = vrot.slane %v646_v35, 1  ;;  %v647_v52 = vmax.f32 %v1804_v28, %v627_v26 }
 0x339   : > { %v783_v5 = vrot.slane %v763_v24, 4  ;;  %v784_v53 = vrot.slane %v764_v32, 4  ;;  %v737_v54 = vsel %vm731_vm1, %v724_v6, %v725_v25  ;;  %v813_v4 = vmax.f32 %v1840_v2, %v1882_v50 }
 0x33a   : > { %v765_v18 = vmax.f32 %v704_v9, %v737_v54  ;;  %v726_v39 = vrot.slane %v706_v42, 2  ;;  %v673_v37 = vsel %vm670_vm0, %v664_v12, %v665_v51  ;;  %v672_v44 = vsel %vm670_vm0, %v665_v51, %v666_v43 }
 0x33b   : > { %v1987_v55 = vsel %vm792_vm2, %v782_v22, %v783_v5  ;;  %v800_v28 = vsel %vm792_vm2, %v783_v5, %v784_v53  ;;  %v707_v60 = vmax.f32 %v644_v45, %v673_v37  ;;  %v708_v61 = vmax.f32 %v645_v10, %v672_v44 }
 0x33c   : > { %v785_v7 = vrot.slane %v765_v18, 4  ;;  %v736_v50 = vsel %vm731_vm1, %v725_v25, %v726_v39  ;;  %v667_v9 = vrot.slane %v647_v52, 1  ;;  %v1995_v12 = vmax.f32 %v1852_v17, %v1876_v49 }
 0x33d   : > { %v1997_v15 = vmax.f32 %v705_v56, %v736_v50  ;;  %v727_v11 = vrot.slane %v707_v60, 2  ;;  %v728_v6 = vrot.slane %v708_v61, 2  ;;  %v2001_v22 = vmax.f32 %v1854_v21, %v1894_v57 }
 0x33e   : > { %v799_v45 = vsel %vm792_vm2, %v784_v53, %v785_v7  ;;  %v671_v27 = vsel %vm670_vm0, %v666_v43, %v667_v9  ;;  %v690_v17 = vsel %vm670_vm0, %v667_v9, %v648_v36  ;;  %v833_v49 = vmax.f32 %v813_v4, %v1995_v12 }
 0x33f   : > { %v786_v56 = vrot.slane %v1997_v15, 4  ;;  %v735_v10 = vsel %vm731_vm1, %v726_v39, %v727_v11  ;;  %v734_v21 = vsel %vm731_vm1, %v727_v11, %v728_v6  ;;  %v709_v57 = vmax.f32 %v646_v35, %v671_v27 }
 0x340   : > { %v767_v26 = vmax.f32 %v706_v42, %v735_v10  ;;  %v768_v13 = vmax.f32 %v707_v60, %v734_v21  ;;  %v710_v0 = vmax.f32 %v647_v52, %v690_v17  ;;  %v816_v16 = vmax.f32 %v1868_v34, %v1898_v58 }
 0x341   : > { %v798_v36 = vsel %vm792_vm2, %v785_v7, %v786_v56  ;;  %v729_v25 = vrot.slane %v709_v57, 2  ;;  %v818_v51 = vmax.f32 %v1900_v59, %v1922_v1  ;;  %v819_v43 = vmax.f32 %v1902_v62, %v805_v19 }
 0x342   : > { %v787_v5 = vrot.slane %v767_v26, 4  ;;  %v788_v53 = vrot.slane %v768_v13, 4  ;;  %v730_v54 = vrot.slane %v710_v0, 2  ;;  %v820_v35 = vmax.f32 %v1931_v46, %v1954_v3 }
 0x343   : > { %v733_v42 = vsel %vm731_vm1, %v728_v6, %v729_v25  ;;  %v821_v34 = vmax.f32 %v1933_v47, %v803_v29  ;;  %v823_v58 = vmax.f32 %v1948_v8, %v1987_v55  ;;  %v824_v52 = vmax.f32 %v763_v24, %v800_v28 }
 0x344   : > { %v797_v59 = vsel %vm792_vm2, %v786_v56, %v787_v5  ;;  %v732_v62 = vsel %vm731_vm1, %v729_v25, %v730_v54  ;;  %v751_v1 = vsel %vm731_vm1, %v730_v54, %v711_v48  ;;  %v769_v46 = vmax.f32 %v708_v61, %v733_v42 }
 0x345   : > { %v827_v19 = vmax.f32 %v1997_v15, %v797_v59  ;;  %v770_v3 = vmax.f32 %v709_v57, %v732_v62  ;;  %v771_v47 = vmax.f32 %v710_v0, %v751_v1  ;;  %v796_v8 = vsel %vm792_vm2, %v787_v5, %v788_v53 }
 0x346   : > { %v789_v29 = vrot.slane %v769_v46, 4  ;;  %v828_v24 = vmax.f32 %v767_v26, %v796_v8  ;;  %v825_v4 = vmax.f32 %v764_v32, %v799_v45  ;;  %v826_v39 = vmax.f32 %v765_v18, %v798_v36 }
 0x347   : > { %v790_v37 = vrot.slane %v770_v3, 4  ;;  %v791_v44 = vrot.slane %v771_v47, 4  ;;  %v834_v41 = vmax.f32 %v1995_v12, %v2001_v22  ;;  %v835_v48 = vmax.f32 %v2001_v22, %v816_v16 }
 0x348   : > { %v795_v55 = vsel %vm792_vm2, %v788_v53, %v789_v29  ;;  %v836_v28 = vmax.f32 %v816_v16, %v817_v23  ;;  %v838_v60 = vmax.f32 %v818_v51, %v819_v43  ;;  %v839_v61 = vmax.f32 %v819_v43, %v820_v35 }
 0x349   : > { %v793_v32 = vsel %vm792_vm2, %v790_v37, %v791_v44  ;;  %v794_v18 = vsel %vm792_vm2, %v789_v29, %v790_v37  ;;  %v812_v7 = vsel %vm792_vm2, %v791_v44, %v772_v20  ;;  %v829_v50 = vmax.f32 %v768_v13, %v795_v55 }
 0x34a   : > { %v830_v9 = vmax.f32 %v769_v46, %v794_v18  ;;  %v831_v12 = vmax.f32 %v770_v3, %v793_v32  ;;  %v832_v15 = vmax.f32 %v771_v47, %v812_v7  ;;  %v840_v11 = vmax.f32 %v820_v35, %v821_v34 }
 0x34b   : > { %v848_v40 = vmax.f32 %v828_v24, %v829_v50  ;;  %v841_v33 = vmax.f32 %v821_v34, %v822_v14  ;;  %v843_v23 = vmax.f32 %v823_v58, %v824_v52  ;;  %v844_v6 = vmax.f32 %v824_v52, %v825_v4 }
 0x34c   : > { %v849_v22 = vmax.f32 %v829_v50, %v830_v9  ;;  %v850_v45 = vmax.f32 %v830_v9, %v831_v12  ;;  %v851_v27 = vmax.f32 %v831_v12, %v832_v15  ;;  %v845_v17 = vmax.f32 %v825_v4, %v826_v39 }
 0x34d   : > { %v846_v2 = vmax.f32 %v826_v39, %v827_v19  ;;  %v853_v56 = vmax.f32 %v833_v49, %v835_v48  ;;  %v854_v10 = vmax.f32 %v834_v41, %v836_v28  ;;  %v858_v20 = vmax.f32 %v838_v60, %v840_v11 }
 0x34e   : > { %v868_v21 = vmax.f32 %v848_v40, %v850_v45  ;;  %v869_v57 = vmax.f32 %v849_v22, %v851_v27  ;;  %v859_v26 = vmax.f32 %v839_v61, %v841_v33  ;;  %v863_v13 = vmax.f32 %v843_v23, %v845_v17 }
 0x34f   : > { %v864_v0 = vmax.f32 %v844_v6, %v846_v2  ;;  %v873_v16 = vrot.slane %v853_v56, 3  ;;  %v874_v36 = vrot.slane %v854_v10, 3  ;;  %v878_v63 = vrot.slane %v858_v20, 3 }
 0x350   : > { %v888_v38 = vrot.slane %v868_v21, 3  ;;  %v889_v14 = vrot.slane %v869_v57, 3  ;;  %v879_v25 = vrot.slane %v859_v26, 3  ;;  %v939_v51 = vand.u32 127, %v668_v30 }
 0x351   : > { %v883_v43 = vrot.slane %v863_v13, 3  ;;  %v884_v5 = vrot.slane %v864_v0, 3  ;;  %v912_v49 = vsel %vm893_vm3, %v873_v16, %v874_v36 }
 0x352   : > { %v897_v53 = vsel %vm893_vm3, %v888_v38, %v889_v14  ;;  %v907_v54 = vsel %vm893_vm3, %v878_v63, %v879_v25  ;;  %v914_v58 = vmax.f32 %v853_v56, %v912_v49  ;;  %vm944_vm4 = vcmp.lt.s32.totalorder %v939_v51, 94 }
 0x353   : > { %v902_v35 = vsel %vm893_vm3, %v883_v43, %v884_v5  ;;  %v919_v42 = vmax.f32 %v858_v20, %v907_v54  ;;  %v929_v34 = vmax.f32 %v868_v21, %v897_v53  ;;  %vm945_vm5 = vmand %vm731_vm1, %vm944_vm4 }
 0x354   : > { %v924_v30 = vmax.f32 %v863_v13, %v902_v35 }
 0x355   : > { %v970_v52 = vsub.f32 %v919_v42, %v929_v34 }
 0x356   : > { %v950_v59 = vsub.f32 %v914_v58, %v924_v30 }
 0x357   : > { %v975_v62 = vand.u32 2147483647, %v970_v52 }
 0x358   : > { %v955_v1 = vand.u32 2147483647, %v950_v59 }
 0x359   : > { %v980_v46 = vsel %vm945_vm5, %v975_v62, 0.0 }
 0x35a   : > { %v960_v19 = vsel %vm945_vm5, %v955_v1, 0.0 }
 0x35b   : > { %v985_v3 = vadd.f32 %v980_v46, %v960_v19 }
 0x35d   : > { %990 = vst [vmem:[%s201_s26] sm:$0xff] %v985_v3 }
 0x35e   : > { %1272 = shalt.err (!%p1269_p4)
}
 0x35f   : > { %s1273_s29 = scalar_lea.hbm %s1003_s7, 128  ;;  %s1277_s4 = scalar_lea.hbm %s2111_s2, 256 }
 0x360   : > { %p1274_p9 = scmp.ne.s32.totalorder %s1003_s7, %s1273_s29  ;;  %p1278_p5 = scmp.lt.s32.totalorder %s1003_s7, %s2111_s2 }
 0x361   : > { %p1279_p8 = scmp.lt.s32.totalorder %s1277_s4, %s1273_s29 }
 0x362   : > { %p1275_p11 = pnand %p1274_p9, %p2120_p1 }
 0x363   : > { %p1280_p6 = por %p1279_p8, %p1278_p5 }
 0x364   : > { %p1276_p3 = pneg %p1275_p11 }
 0x366   : > { %p1281_p13 = pnand %p1280_p6, %p1276_p3 }
 0x368   : > { %1284 = shalt.err (!%p1281_p13)
}
 0x369   : > { %1148 = dma.vmem_to_hbm [thread:$0]  (%p2120_p1), %s1006_s22, 128, %s1003_s7, %s992_s30  }
 0x36a PF: > { %s1017_s16 = sand.u32 1, %s1315_s9   ;;  %p2121_p12 = scmp.ne.s32.totalorder %s2116_s21, 0 }
 0x36b   : > { %p2122_p7 = scmp.ge.s32.totalorder %s1327_s12, 2  ;;  %s1018_s27 = scalar_lea.sflag [#allocation4], %s1017_s16 }
 0x36d   : > { %p1158_p10 = pnand %p2122_p7, %p2121_p12 }
 0x36f   : > { %p1159_p0 = pneg %p1158_p10 }
 0x371   : > { %1310 = dma.done.wait (%p1159_p0), %s1018_s27, 128  }
 0x372   : > { %1312 = vsyncadd (%p1159_p0), %s1018_s27, 4294967168  ;;  %p18_p2 = scmp.ge.s32.totalorder %s1380_s15, 4   ;;  %s2123_s9 = smov %s1319_s10 }
 0x373   : > { %s2124_s10 = smov %s1323_s11  ;;  %s2125_s11 = smov %s1392_s18 }
 0x374   : > { %s2126_s12 = smov %s1380_s15  ;;  %20 = sbr.rel (!%p18_p2) target bundleno = 7 (0x7), region = 92 }
 0x379   :  { %1023 = vsyncpa [#allocation3], 1 }
 0x37a   :  { %1025 = vsyncpa [#allocation3 + $0x1], 1 }
 0x37b   :  { %1026 = vsyncpa [#allocation6], 1 }
 0x37c   :  { %1028 = vsyncpa [#allocation6 + $0x1], 1 }
 0x37d   :  { %1029 = vsyncpa [#allocation4], 1 }
 0x37e   :  { %1031 = vsyncpa [#allocation4 + $0x1], 1 }

</bundles_post_ra>
